<compile_context>
chip_gen: v7x
topology: tpu7x:2x2x1
jax: 0.10.0
libtpu: 0.0.40
codegen_flags: <defaults>
</compile_context>

<pallas_src>
import functools

import jax
import jax.numpy as jnp
from jax import lax
from jax.experimental import pallas as pl
from jax.experimental.pallas import tpu as pltpu


# Generation-safe scoped-VMEM limit (stays below v7x's 64 MiB physical VMEM;
# re-derive the TILE_L / scratch budget before porting large shapes to v7x).
_VMEM_LIMIT = 48 * 1024 * 1024


def _prop_kernel(a_ref, x_ref, ho_ref, h_ref, m_ref, *, c_in, gdep, alpha, tile_l):
    """Mix-hop propagation for one (batch, L-tile) grid step.

    a_ref : (V, V)                     pre-normalized adjacency (constant block)
    x_ref : (1, C, V, TILE_L)          input block (native NCHW, L in lanes)
    ho_ref: (1, (gdep+1)*C, V, TILE_L) concatenated depth planes (output)
    h_ref : (V, C*TILE_L)              VMEM scratch: current depth state
    m_ref : (V, C*TILE_L)              VMEM scratch: a @ h (matmul result)
    """
    f32 = jnp.float32
    t = tile_l
    a = a_ref[...].astype(f32)

    # Depth 0: stage x into the (V, C*TILE_L) propagation layout (channel
    # planes at 128-aligned lane offsets; same-layout copies, no relayout)
    # and emit h_0.  Every plane is consumed immediately, so live ranges stay
    # at one (V, TILE_L) tile even though the channel loop is unrolled.
    for c in range(c_in):
        plane = x_ref[0, c].astype(f32)                       # (V, TILE_L)
        h_ref[:, c * t:(c + 1) * t] = plane
        ho_ref[0, c] = plane.astype(ho_ref.dtype)

    for d in range(1, gdep + 1):
        # One wide MXU matmul per depth: (V, V) @ (V, C*TILE_L).  The store
        # into m_ref is the only consumer, so the result streams to scratch.
        m_ref[...] = jnp.dot(a, h_ref[...], preferred_element_type=f32)
        for c in range(c_in):
            plane = (alpha * x_ref[0, c].astype(f32)
                     + (1.0 - alpha) * m_ref[:, c * t:(c + 1) * t])
            h_ref[:, c * t:(c + 1) * t] = plane
            ho_ref[0, d * c_in + c] = plane.astype(ho_ref.dtype)


def _mlp_kernel(w_ref, b_ref, ho_ref, o_ref):
    """1x1-conv channel mix for one (batch, M-tile) grid step (MXU matmul).

    w_ref : (c_out, K)       weights, VMEM (tiling-padded by the compiler)
    b_ref : (c_out, 1)       bias, VMEM
    ho_ref: (1, K, TILE_M)   concatenated depth planes, (v, l) flattened in lanes
    o_ref : (1, c_out, TILE_M)
    """
    acc = jnp.dot(w_ref[...].astype(jnp.float32),
                  ho_ref[0].astype(jnp.float32),
                  preferred_element_type=jnp.float32)
    o_ref[0] = (acc + b_ref[...]).astype(o_ref.dtype)


def mixprop_pallas(x, adj, weight, bias, *, gdep, alpha, tile_l=128, tile_m=512):
    """x: (N, C, V, L); adj: (V, V); weight: (c_out, (gdep+1)*C); bias: (c_out,)."""
    N, C, V, L = x.shape
    c_out, K = weight.shape
    assert K == (gdep + 1) * C

    # --- wrapper-side prep (hoisted out of the grid) -------------------------
    # Ragged L: zero-pad to a multiple of TILE_L (propagation is linear over V
    # only, so padded columns stay zero and are sliced off at the end).
    lp = pl.cdiv(L, tile_l) * tile_l
    xp = x if lp == L else jnp.pad(x, ((0, 0), (0, 0), (0, 0), (0, lp - L)))

    # Adjacency normalization (adj + I, row-normalize), computed once.
    a = adj.astype(jnp.float32) + jnp.eye(V, dtype=jnp.float32)
    a = a / jnp.sum(a, axis=1, keepdims=True)

    # --- kernel 1: mix-hop propagation -> ho in native NCHW ------------------
    prop = functools.partial(_prop_kernel, c_in=C, gdep=gdep,
                             alpha=float(alpha), tile_l=tile_l)
    ho = pl.pallas_call(
        prop,
        out_shape=jax.ShapeDtypeStruct((N, K, V, lp), x.dtype),
        grid_spec=pltpu.PrefetchScalarGridSpec(
            num_scalar_prefetch=0,
            grid=(N, lp // tile_l),
            in_specs=[
                pl.BlockSpec((V, V), lambda n, t: (0, 0)),
                pl.BlockSpec((1, C, V, tile_l), lambda n, t: (n, 0, 0, t)),
            ],
            out_specs=pl.BlockSpec((1, K, V, tile_l), lambda n, t: (n, 0, 0, t)),
            scratch_shapes=[pltpu.VMEM((V, C * tile_l), jnp.float32),
                            pltpu.VMEM((V, C * tile_l), jnp.float32)],
        ),
        compiler_params=pltpu.CompilerParams(
            dimension_semantics=("parallel", "parallel"),
            vmem_limit_bytes=_VMEM_LIMIT),
    )(a, xp)

    # --- kernel 2: 1x1 conv = W @ ho over channels (MXU matmul) --------------
    # Free (contiguous) reshape: ho (N, K, V, Lp) -> (N, K, V*Lp).  This HBM
    # round trip realizes the channels-to-sublanes relayout the conv needs.
    m = V * lp
    ho2 = ho.reshape(N, K, m)
    tm = min(tile_m, m)
    w2 = weight.astype(jnp.float32)
    b2 = bias.astype(jnp.float32).reshape(c_out, 1)
    out2 = pl.pallas_call(
        _mlp_kernel,
        out_shape=jax.ShapeDtypeStruct((N, c_out, m), x.dtype),
        grid_spec=pltpu.PrefetchScalarGridSpec(
            num_scalar_prefetch=0,
            grid=(N, pl.cdiv(m, tm)),
            in_specs=[
                pl.BlockSpec((c_out, K), lambda n, j: (0, 0)),
                pl.BlockSpec((c_out, 1), lambda n, j: (0, 0)),
                pl.BlockSpec((1, K, tm), lambda n, j: (n, 0, j)),
            ],
            out_specs=pl.BlockSpec((1, c_out, tm), lambda n, j: (n, 0, j)),
        ),
        compiler_params=pltpu.CompilerParams(
            dimension_semantics=("parallel", "parallel"),
            vmem_limit_bytes=_VMEM_LIMIT),
    )(w2, b2, ho2)

    out = out2.reshape(N, c_out, V, lp)
    if lp != L:
        out = out[..., :L]
    return out


def mixprop_ref(x, adj, weight, bias, *, gdep, alpha):
    """Pure-JAX reference mirroring the PyTorch module."""
    V = adj.shape[0]
    a = adj + jnp.eye(V, dtype=adj.dtype)
    a = a / a.sum(axis=1)[:, None]
    h = x
    outs = [h]
    for _ in range(gdep):
        h = alpha * x + (1.0 - alpha) * jnp.einsum(
            'ncwl,vw->ncvl', h, a, precision=lax.Precision.HIGHEST)
        outs.append(h)
    ho = jnp.concatenate(outs, axis=1)
    o = jnp.einsum('ok,nkvl->novl', weight, ho,
                   precision=lax.Precision.HIGHEST) + bias[None, :, None, None]
    return o


if __name__ == "__main__":
    # Small deterministic example: L = 256 -> two lane-dense 128-wide L tiles.
    N, C_IN, V, L = 2, 4, 16, 256
    C_OUT, GDEP, ALPHA = 8, 2, 0.05
    # NOTE: self.dropout is stored by the module but never applied in forward().

    key = jax.random.PRNGKey(0)
    kx, ka, kw, kb = jax.random.split(key, 4)

    x = jax.random.normal(kx, (N, C_IN, V, L), dtype=jnp.float32)
    adj = jax.random.uniform(ka, (V, V), dtype=jnp.float32)

    # Deterministic "Conv2d(1x1)" parameters.
    K = (GDEP + 1) * C_IN
    bound = 1.0 / jnp.sqrt(jnp.float32(K))
    weight = jax.random.uniform(kw, (C_OUT, K), minval=-bound, maxval=bound,
                                dtype=jnp.float32)
    bias = jax.random.uniform(kb, (C_OUT,), minval=-bound, maxval=bound,
                              dtype=jnp.float32)

    out = mixprop_pallas(x, adj, weight, bias, gdep=GDEP, alpha=ALPHA)
    out = jax.block_until_ready(out)

    ref = mixprop_ref(x, adj, weight, bias, gdep=GDEP, alpha=ALPHA)
    assert out.shape == (N, C_OUT, V, L), out.shape
    max_err = float(jnp.max(jnp.abs(out - ref)))
    assert jnp.allclose(out, ref, rtol=1e-5, atol=1e-4), max_err

    print("KERNEL_OK")
</pallas_src>

<mosaic_0001>
module attributes {stable_mosaic.version = 11 : i64} {
  func.func @_prop_kernel(%arg0: i32, %arg1: i32, %arg2: memref<16x16xf32, #tpu.memory_space<vmem>>, %arg3: memref<1x4x16x128xf32, #tpu.memory_space<vmem>>, %arg4: memref<1x12x16x128xf32, #tpu.memory_space<vmem>>, %arg5: memref<16x512xf32, #tpu.memory_space<vmem>>, %arg6: memref<16x512xf32, #tpu.memory_space<vmem>>) attributes {dimension_semantics = [#tpu.dimension_semantics<parallel>, #tpu.dimension_semantics<parallel>], iteration_bounds = array<i64: 2, 2>, scalar_prefetch = 0 : i64, scratch_operands = 2 : i64, tpu.core_type = #tpu.core_type<tc>, window_params = [{pipeline_mode = #tpu.pipeline_mode<synchronous>, transform_indices = @transform_0, window_bounds = array<i64: 16, 16>}, {transform_indices = @transform_1, window_bounds = array<i64: 1, 4, 16, 128>}, {transform_indices = @transform_2, window_bounds = array<i64: 1, 12, 16, 128>}]} {
    %c0 = arith.constant 0 : index
    %c0_0 = arith.constant 0 : index
    %0 = vector.load %arg2[%c0, %c0_0] : memref<16x16xf32, #tpu.memory_space<vmem>>, vector<16x16xf32>
    %c0_1 = arith.constant 0 : index
    %c0_2 = arith.constant 0 : index
    %c0_3 = arith.constant 0 : index
    %c0_4 = arith.constant 0 : index
    %1 = vector.load %arg3[%c0_1, %c0_2, %c0_3, %c0_4] : memref<1x4x16x128xf32, #tpu.memory_space<vmem>>, vector<1x1x16x128xf32>
    %2 = vector.shape_cast %1 : vector<1x1x16x128xf32> to vector<16x128xf32>
    %c0_5 = arith.constant 0 : index
    %c0_6 = arith.constant 0 : index
    %3 = vector.load %arg5[%c0_5, %c0_6] : memref<16x512xf32, #tpu.memory_space<vmem>>, vector<16x128xf32>
    tpu.vector_store %arg5[%c0_5, %c0_6], %2 {strides = array<i32>} : memref<16x512xf32, #tpu.memory_space<vmem>>, vector<16x128xf32>,
    %c0_7 = arith.constant 0 : index
    %c0_8 = arith.constant 0 : index
    %c0_9 = arith.constant 0 : index
    %c0_10 = arith.constant 0 : index
    %4 = vector.load %arg4[%c0_7, %c0_8, %c0_9, %c0_10] : memref<1x12x16x128xf32, #tpu.memory_space<vmem>>, vector<1x1x16x128xf32>
    %5 = vector.shape_cast %4 : vector<1x1x16x128xf32> to vector<16x128xf32>
    %6 = vector.shape_cast %2 : vector<16x128xf32> to vector<1x1x16x128xf32>
    tpu.vector_store %arg4[%c0_7, %c0_8, %c0_9, %c0_10], %6 {strides = array<i32>} : memref<1x12x16x128xf32, #tpu.memory_space<vmem>>, vector<1x1x16x128xf32>,
    %c0_11 = arith.constant 0 : index
    %c1 = arith.constant 1 : index
    %c0_12 = arith.constant 0 : index
    %c0_13 = arith.constant 0 : index
    %7 = vector.load %arg3[%c0_11, %c1, %c0_12, %c0_13] : memref<1x4x16x128xf32, #tpu.memory_space<vmem>>, vector<1x1x16x128xf32>
    %8 = vector.shape_cast %7 : vector<1x1x16x128xf32> to vector<16x128xf32>
    %c0_14 = arith.constant 0 : index
    %c128 = arith.constant 128 : index
    %9 = vector.load %arg5[%c0_14, %c128] : memref<16x512xf32, #tpu.memory_space<vmem>>, vector<16x128xf32>
    tpu.vector_store %arg5[%c0_14, %c128], %8 {strides = array<i32>} : memref<16x512xf32, #tpu.memory_space<vmem>>, vector<16x128xf32>,
    %c0_15 = arith.constant 0 : index
    %c1_16 = arith.constant 1 : index
    %c0_17 = arith.constant 0 : index
    %c0_18 = arith.constant 0 : index
    %10 = vector.load %arg4[%c0_15, %c1_16, %c0_17, %c0_18] : memref<1x12x16x128xf32, #tpu.memory_space<vmem>>, vector<1x1x16x128xf32>
    %11 = vector.shape_cast %10 : vector<1x1x16x128xf32> to vector<16x128xf32>
    %12 = vector.shape_cast %8 : vector<16x128xf32> to vector<1x1x16x128xf32>
    tpu.vector_store %arg4[%c0_15, %c1_16, %c0_17, %c0_18], %12 {strides = array<i32>} : memref<1x12x16x128xf32, #tpu.memory_space<vmem>>, vector<1x1x16x128xf32>,
    %c0_19 = arith.constant 0 : index
    %c2 = arith.constant 2 : index
    %c0_20 = arith.constant 0 : index
    %c0_21 = arith.constant 0 : index
    %13 = vector.load %arg3[%c0_19, %c2, %c0_20, %c0_21] : memref<1x4x16x128xf32, #tpu.memory_space<vmem>>, vector<1x1x16x128xf32>
    %14 = vector.shape_cast %13 : vector<1x1x16x128xf32> to vector<16x128xf32>
    %c0_22 = arith.constant 0 : index
    %c256 = arith.constant 256 : index
    %15 = vector.load %arg5[%c0_22, %c256] : memref<16x512xf32, #tpu.memory_space<vmem>>, vector<16x128xf32>
    tpu.vector_store %arg5[%c0_22, %c256], %14 {strides = array<i32>} : memref<16x512xf32, #tpu.memory_space<vmem>>, vector<16x128xf32>,
    %c0_23 = arith.constant 0 : index
    %c2_24 = arith.constant 2 : index
    %c0_25 = arith.constant 0 : index
    %c0_26 = arith.constant 0 : index
    %16 = vector.load %arg4[%c0_23, %c2_24, %c0_25, %c0_26] : memref<1x12x16x128xf32, #tpu.memory_space<vmem>>, vector<1x1x16x128xf32>
    %17 = vector.shape_cast %16 : vector<1x1x16x128xf32> to vector<16x128xf32>
    %18 = vector.shape_cast %14 : vector<16x128xf32> to vector<1x1x16x128xf32>
    tpu.vector_store %arg4[%c0_23, %c2_24, %c0_25, %c0_26], %18 {strides = array<i32>} : memref<1x12x16x128xf32, #tpu.memory_space<vmem>>, vector<1x1x16x128xf32>,
    %c0_27 = arith.constant 0 : index
    %c3 = arith.constant 3 : index
    %c0_28 = arith.constant 0 : index
    %c0_29 = arith.constant 0 : index
    %19 = vector.load %arg3[%c0_27, %c3, %c0_28, %c0_29] : memref<1x4x16x128xf32, #tpu.memory_space<vmem>>, vector<1x1x16x128xf32>
    %20 = vector.shape_cast %19 : vector<1x1x16x128xf32> to vector<16x128xf32>
    %c0_30 = arith.constant 0 : index
    %c384 = arith.constant 384 : index
    %21 = vector.load %arg5[%c0_30, %c384] : memref<16x512xf32, #tpu.memory_space<vmem>>, vector<16x128xf32>
    tpu.vector_store %arg5[%c0_30, %c384], %20 {strides = array<i32>} : memref<16x512xf32, #tpu.memory_space<vmem>>, vector<16x128xf32>,
    %c0_31 = arith.constant 0 : index
    %c3_32 = arith.constant 3 : index
    %c0_33 = arith.constant 0 : index
    %c0_34 = arith.constant 0 : index
    %22 = vector.load %arg4[%c0_31, %c3_32, %c0_33, %c0_34] : memref<1x12x16x128xf32, #tpu.memory_space<vmem>>, vector<1x1x16x128xf32>
    %23 = vector.shape_cast %22 : vector<1x1x16x128xf32> to vector<16x128xf32>
    %24 = vector.shape_cast %20 : vector<16x128xf32> to vector<1x1x16x128xf32>
    tpu.vector_store %arg4[%c0_31, %c3_32, %c0_33, %c0_34], %24 {strides = array<i32>} : memref<1x12x16x128xf32, #tpu.memory_space<vmem>>, vector<1x1x16x128xf32>,
    %c0_35 = arith.constant 0 : index
    %c0_36 = arith.constant 0 : index
    %25 = vector.load %arg5[%c0_35, %c0_36] : memref<16x512xf32, #tpu.memory_space<vmem>>, vector<16x512xf32>
    %cst = arith.constant dense<0.000000e+00> : vector<16x512xf32>
    %26 = tpu.matmul %0, %25, %cst {dimension_numbers = #tpu.dot_dimension_numbers<[1], [0], [0], [1], [0, 0, 1, 1], [], []>} : vector<16x16xf32>, vector<16x512xf32>, vector<16x512xf32> -> vector<16x512xf32>
    %c0_37 = arith.constant 0 : index
    %c0_38 = arith.constant 0 : index
    %27 = vector.load %arg6[%c0_37, %c0_38] : memref<16x512xf32, #tpu.memory_space<vmem>>, vector<16x512xf32>
    tpu.vector_store %arg6[%c0_37, %c0_38], %26 {strides = array<i32>} : memref<16x512xf32, #tpu.memory_space<vmem>>, vector<16x512xf32>,
    %c0_39 = arith.constant 0 : index
    %c0_40 = arith.constant 0 : index
    %c0_41 = arith.constant 0 : index
    %c0_42 = arith.constant 0 : index
    %28 = vector.load %arg3[%c0_39, %c0_40, %c0_41, %c0_42] : memref<1x4x16x128xf32, #tpu.memory_space<vmem>>, vector<1x1x16x128xf32>
    %29 = vector.shape_cast %28 : vector<1x1x16x128xf32> to vector<16x128xf32>
    %cst_43 = arith.constant 5.000000e-02 : f32
    %30 = vector.broadcast %cst_43 : f32 to vector<16x128xf32>
    %31 = arith.mulf %30, %29 : vector<16x128xf32>
    %c0_44 = arith.constant 0 : index
    %c0_45 = arith.constant 0 : index
    %32 = vector.load %arg6[%c0_44, %c0_45] : memref<16x512xf32, #tpu.memory_space<vmem>>, vector<16x128xf32>
    %cst_46 = arith.constant 0.949999988 : f32
    %33 = vector.broadcast %cst_46 : f32 to vector<16x128xf32>
    %34 = arith.mulf %33, %32 : vector<16x128xf32>
    %35 = arith.addf %31, %34 : vector<16x128xf32>
    %c0_47 = arith.constant 0 : index
    %c0_48 = arith.constant 0 : index
    %36 = vector.load %arg5[%c0_47, %c0_48] : memref<16x512xf32, #tpu.memory_space<vmem>>, vector<16x128xf32>
    tpu.vector_store %arg5[%c0_47, %c0_48], %35 {strides = array<i32>} : memref<16x512xf32, #tpu.memory_space<vmem>>, vector<16x128xf32>,
    %c0_49 = arith.constant 0 : index
    %c4 = arith.constant 4 : index
    %c0_50 = arith.constant 0 : index
    %c0_51 = arith.constant 0 : index
    %37 = vector.load %arg4[%c0_49, %c4, %c0_50, %c0_51] : memref<1x12x16x128xf32, #tpu.memory_space<vmem>>, vector<1x1x16x128xf32>
    %38 = vector.shape_cast %37 : vector<1x1x16x128xf32> to vector<16x128xf32>
    %39 = vector.shape_cast %35 : vector<16x128xf32> to vector<1x1x16x128xf32>
    tpu.vector_store %arg4[%c0_49, %c4, %c0_50, %c0_51], %39 {strides = array<i32>} : memref<1x12x16x128xf32, #tpu.memory_space<vmem>>, vector<1x1x16x128xf32>,
    %c0_52 = arith.constant 0 : index
    %c1_53 = arith.constant 1 : index
    %c0_54 = arith.constant 0 : index
    %c0_55 = arith.constant 0 : index
    %40 = vector.load %arg3[%c0_52, %c1_53, %c0_54, %c0_55] : memref<1x4x16x128xf32, #tpu.memory_space<vmem>>, vector<1x1x16x128xf32>
    %41 = vector.shape_cast %40 : vector<1x1x16x128xf32> to vector<16x128xf32>
    %cst_56 = arith.constant 5.000000e-02 : f32
    %42 = vector.broadcast %cst_56 : f32 to vector<16x128xf32>
    %43 = arith.mulf %42, %41 : vector<16x128xf32>
    %c0_57 = arith.constant 0 : index
    %c128_58 = arith.constant 128 : index
    %44 = vector.load %arg6[%c0_57, %c128_58] : memref<16x512xf32, #tpu.memory_space<vmem>>, vector<16x128xf32>
    %cst_59 = arith.constant 0.949999988 : f32
    %45 = vector.broadcast %cst_59 : f32 to vector<16x128xf32>
    %46 = arith.mulf %45, %44 : vector<16x128xf32>
    %47 = arith.addf %43, %46 : vector<16x128xf32>
    %c0_60 = arith.constant 0 : index
    %c128_61 = arith.constant 128 : index
    %48 = vector.load %arg5[%c0_60, %c128_61] : memref<16x512xf32, #tpu.memory_space<vmem>>, vector<16x128xf32>
    tpu.vector_store %arg5[%c0_60, %c128_61], %47 {strides = array<i32>} : memref<16x512xf32, #tpu.memory_space<vmem>>, vector<16x128xf32>,
    %c0_62 = arith.constant 0 : index
    %c5 = arith.constant 5 : index
    %c0_63 = arith.constant 0 : index
    %c0_64 = arith.constant 0 : index
    %49 = vector.load %arg4[%c0_62, %c5, %c0_63, %c0_64] : memref<1x12x16x128xf32, #tpu.memory_space<vmem>>, vector<1x1x16x128xf32>
    %50 = vector.shape_cast %49 : vector<1x1x16x128xf32> to vector<16x128xf32>
    %51 = vector.shape_cast %47 : vector<16x128xf32> to vector<1x1x16x128xf32>
    tpu.vector_store %arg4[%c0_62, %c5, %c0_63, %c0_64], %51 {strides = array<i32>} : memref<1x12x16x128xf32, #tpu.memory_space<vmem>>, vector<1x1x16x128xf32>,
    %c0_65 = arith.constant 0 : index
    %c2_66 = arith.constant 2 : index
    %c0_67 = arith.constant 0 : index
    %c0_68 = arith.constant 0 : index
    %52 = vector.load %arg3[%c0_65, %c2_66, %c0_67, %c0_68] : memref<1x4x16x128xf32, #tpu.memory_space<vmem>>, vector<1x1x16x128xf32>
    %53 = vector.shape_cast %52 : vector<1x1x16x128xf32> to vector<16x128xf32>
    %cst_69 = arith.constant 5.000000e-02 : f32
    %54 = vector.broadcast %cst_69 : f32 to vector<16x128xf32>
    %55 = arith.mulf %54, %53 : vector<16x128xf32>
    %c0_70 = arith.constant 0 : index
    %c256_71 = arith.constant 256 : index
    %56 = vector.load %arg6[%c0_70, %c256_71] : memref<16x512xf32, #tpu.memory_space<vmem>>, vector<16x128xf32>
    %cst_72 = arith.constant 0.949999988 : f32
    %57 = vector.broadcast %cst_72 : f32 to vector<16x128xf32>
    %58 = arith.mulf %57, %56 : vector<16x128xf32>
    %59 = arith.addf %55, %58 : vector<16x128xf32>
    %c0_73 = arith.constant 0 : index
    %c256_74 = arith.constant 256 : index
    %60 = vector.load %arg5[%c0_73, %c256_74] : memref<16x512xf32, #tpu.memory_space<vmem>>, vector<16x128xf32>
    tpu.vector_store %arg5[%c0_73, %c256_74], %59 {strides = array<i32>} : memref<16x512xf32, #tpu.memory_space<vmem>>, vector<16x128xf32>,
    %c0_75 = arith.constant 0 : index
    %c6 = arith.constant 6 : index
    %c0_76 = arith.constant 0 : index
    %c0_77 = arith.constant 0 : index
    %61 = vector.load %arg4[%c0_75, %c6, %c0_76, %c0_77] : memref<1x12x16x128xf32, #tpu.memory_space<vmem>>, vector<1x1x16x128xf32>
    %62 = vector.shape_cast %61 : vector<1x1x16x128xf32> to vector<16x128xf32>
    %63 = vector.shape_cast %59 : vector<16x128xf32> to vector<1x1x16x128xf32>
    tpu.vector_store %arg4[%c0_75, %c6, %c0_76, %c0_77], %63 {strides = array<i32>} : memref<1x12x16x128xf32, #tpu.memory_space<vmem>>, vector<1x1x16x128xf32>,
    %c0_78 = arith.constant 0 : index
    %c3_79 = arith.constant 3 : index
    %c0_80 = arith.constant 0 : index
    %c0_81 = arith.constant 0 : index
    %64 = vector.load %arg3[%c0_78, %c3_79, %c0_80, %c0_81] : memref<1x4x16x128xf32, #tpu.memory_space<vmem>>, vector<1x1x16x128xf32>
    %65 = vector.shape_cast %64 : vector<1x1x16x128xf32> to vector<16x128xf32>
    %cst_82 = arith.constant 5.000000e-02 : f32
    %66 = vector.broadcast %cst_82 : f32 to vector<16x128xf32>
    %67 = arith.mulf %66, %65 : vector<16x128xf32>
    %c0_83 = arith.constant 0 : index
    %c384_84 = arith.constant 384 : index
    %68 = vector.load %arg6[%c0_83, %c384_84] : memref<16x512xf32, #tpu.memory_space<vmem>>, vector<16x128xf32>
    %cst_85 = arith.constant 0.949999988 : f32
    %69 = vector.broadcast %cst_85 : f32 to vector<16x128xf32>
    %70 = arith.mulf %69, %68 : vector<16x128xf32>
    %71 = arith.addf %67, %70 : vector<16x128xf32>
    %c0_86 = arith.constant 0 : index
    %c384_87 = arith.constant 384 : index
    %72 = vector.load %arg5[%c0_86, %c384_87] : memref<16x512xf32, #tpu.memory_space<vmem>>, vector<16x128xf32>
    tpu.vector_store %arg5[%c0_86, %c384_87], %71 {strides = array<i32>} : memref<16x512xf32, #tpu.memory_space<vmem>>, vector<16x128xf32>,
    %c0_88 = arith.constant 0 : index
    %c7 = arith.constant 7 : index
    %c0_89 = arith.constant 0 : index
    %c0_90 = arith.constant 0 : index
    %73 = vector.load %arg4[%c0_88, %c7, %c0_89, %c0_90] : memref<1x12x16x128xf32, #tpu.memory_space<vmem>>, vector<1x1x16x128xf32>
    %74 = vector.shape_cast %73 : vector<1x1x16x128xf32> to vector<16x128xf32>
    %75 = vector.shape_cast %71 : vector<16x128xf32> to vector<1x1x16x128xf32>
    tpu.vector_store %arg4[%c0_88, %c7, %c0_89, %c0_90], %75 {strides = array<i32>} : memref<1x12x16x128xf32, #tpu.memory_space<vmem>>, vector<1x1x16x128xf32>,
    %c0_91 = arith.constant 0 : index
    %c0_92 = arith.constant 0 : index
    %76 = vector.load %arg5[%c0_91, %c0_92] : memref<16x512xf32, #tpu.memory_space<vmem>>, vector<16x512xf32>
    %cst_93 = arith.constant dense<0.000000e+00> : vector<16x512xf32>
    %77 = tpu.matmul %0, %76, %cst_93 {dimension_numbers = #tpu.dot_dimension_numbers<[1], [0], [0], [1], [0, 0, 1, 1], [], []>} : vector<16x16xf32>, vector<16x512xf32>, vector<16x512xf32> -> vector<16x512xf32>
    %c0_94 = arith.constant 0 : index
    %c0_95 = arith.constant 0 : index
    %78 = vector.load %arg6[%c0_94, %c0_95] : memref<16x512xf32, #tpu.memory_space<vmem>>, vector<16x512xf32>
    tpu.vector_store %arg6[%c0_94, %c0_95], %77 {strides = array<i32>} : memref<16x512xf32, #tpu.memory_space<vmem>>, vector<16x512xf32>,
    %c0_96 = arith.constant 0 : index
    %c0_97 = arith.constant 0 : index
    %c0_98 = arith.constant 0 : index
    %c0_99 = arith.constant 0 : index
    %79 = vector.load %arg3[%c0_96, %c0_97, %c0_98, %c0_99] : memref<1x4x16x128xf32, #tpu.memory_space<vmem>>, vector<1x1x16x128xf32>
    %80 = vector.shape_cast %79 : vector<1x1x16x128xf32> to vector<16x128xf32>
    %cst_100 = arith.constant 5.000000e-02 : f32
    %81 = vector.broadcast %cst_100 : f32 to vector<16x128xf32>
    %82 = arith.mulf %81, %80 : vector<16x128xf32>
    %c0_101 = arith.constant 0 : index
    %c0_102 = arith.constant 0 : index
    %83 = vector.load %arg6[%c0_101, %c0_102] : memref<16x512xf32, #tpu.memory_space<vmem>>, vector<16x128xf32>
    %cst_103 = arith.constant 0.949999988 : f32
    %84 = vector.broadcast %cst_103 : f32 to vector<16x128xf32>
    %85 = arith.mulf %84, %83 : vector<16x128xf32>
    %86 = arith.addf %82, %85 : vector<16x128xf32>
    %c0_104 = arith.constant 0 : index
    %c0_105 = arith.constant 0 : index
    %87 = vector.load %arg5[%c0_104, %c0_105] : memref<16x512xf32, #tpu.memory_space<vmem>>, vector<16x128xf32>
    tpu.vector_store %arg5[%c0_104, %c0_105], %86 {strides = array<i32>} : memref<16x512xf32, #tpu.memory_space<vmem>>, vector<16x128xf32>,
    %c0_106 = arith.constant 0 : index
    %c8 = arith.constant 8 : index
    %c0_107 = arith.constant 0 : index
    %c0_108 = arith.constant 0 : index
    %88 = vector.load %arg4[%c0_106, %c8, %c0_107, %c0_108] : memref<1x12x16x128xf32, #tpu.memory_space<vmem>>, vector<1x1x16x128xf32>
    %89 = vector.shape_cast %88 : vector<1x1x16x128xf32> to vector<16x128xf32>
    %90 = vector.shape_cast %86 : vector<16x128xf32> to vector<1x1x16x128xf32>
    tpu.vector_store %arg4[%c0_106, %c8, %c0_107, %c0_108], %90 {strides = array<i32>} : memref<1x12x16x128xf32, #tpu.memory_space<vmem>>, vector<1x1x16x128xf32>,
    %c0_109 = arith.constant 0 : index
    %c1_110 = arith.constant 1 : index
    %c0_111 = arith.constant 0 : index
    %c0_112 = arith.constant 0 : index
    %91 = vector.load %arg3[%c0_109, %c1_110, %c0_111, %c0_112] : memref<1x4x16x128xf32, #tpu.memory_space<vmem>>, vector<1x1x16x128xf32>
    %92 = vector.shape_cast %91 : vector<1x1x16x128xf32> to vector<16x128xf32>
    %cst_113 = arith.constant 5.000000e-02 : f32
    %93 = vector.broadcast %cst_113 : f32 to vector<16x128xf32>
    %94 = arith.mulf %93, %92 : vector<16x128xf32>
    %c0_114 = arith.constant 0 : index
    %c128_115 = arith.constant 128 : index
    %95 = vector.load %arg6[%c0_114, %c128_115] : memref<16x512xf32, #tpu.memory_space<vmem>>, vector<16x128xf32>
    %cst_116 = arith.constant 0.949999988 : f32
    %96 = vector.broadcast %cst_116 : f32 to vector<16x128xf32>
    %97 = arith.mulf %96, %95 : vector<16x128xf32>
    %98 = arith.addf %94, %97 : vector<16x128xf32>
    %c0_117 = arith.constant 0 : index
    %c128_118 = arith.constant 128 : index
    %99 = vector.load %arg5[%c0_117, %c128_118] : memref<16x512xf32, #tpu.memory_space<vmem>>, vector<16x128xf32>
    tpu.vector_store %arg5[%c0_117, %c128_118], %98 {strides = array<i32>} : memref<16x512xf32, #tpu.memory_space<vmem>>, vector<16x128xf32>,
    %c0_119 = arith.constant 0 : index
    %c9 = arith.constant 9 : index
    %c0_120 = arith.constant 0 : index
    %c0_121 = arith.constant 0 : index
    %100 = vector.load %arg4[%c0_119, %c9, %c0_120, %c0_121] : memref<1x12x16x128xf32, #tpu.memory_space<vmem>>, vector<1x1x16x128xf32>
    %101 = vector.shape_cast %100 : vector<1x1x16x128xf32> to vector<16x128xf32>
    %102 = vector.shape_cast %98 : vector<16x128xf32> to vector<1x1x16x128xf32>
    tpu.vector_store %arg4[%c0_119, %c9, %c0_120, %c0_121], %102 {strides = array<i32>} : memref<1x12x16x128xf32, #tpu.memory_space<vmem>>, vector<1x1x16x128xf32>,
    %c0_122 = arith.constant 0 : index
    %c2_123 = arith.constant 2 : index
    %c0_124 = arith.constant 0 : index
    %c0_125 = arith.constant 0 : index
    %103 = vector.load %arg3[%c0_122, %c2_123, %c0_124, %c0_125] : memref<1x4x16x128xf32, #tpu.memory_space<vmem>>, vector<1x1x16x128xf32>
    %104 = vector.shape_cast %103 : vector<1x1x16x128xf32> to vector<16x128xf32>
    %cst_126 = arith.constant 5.000000e-02 : f32
    %105 = vector.broadcast %cst_126 : f32 to vector<16x128xf32>
    %106 = arith.mulf %105, %104 : vector<16x128xf32>
    %c0_127 = arith.constant 0 : index
    %c256_128 = arith.constant 256 : index
    %107 = vector.load %arg6[%c0_127, %c256_128] : memref<16x512xf32, #tpu.memory_space<vmem>>, vector<16x128xf32>
    %cst_129 = arith.constant 0.949999988 : f32
    %108 = vector.broadcast %cst_129 : f32 to vector<16x128xf32>
    %109 = arith.mulf %108, %107 : vector<16x128xf32>
    %110 = arith.addf %106, %109 : vector<16x128xf32>
    %c0_130 = arith.constant 0 : index
    %c256_131 = arith.constant 256 : index
    %111 = vector.load %arg5[%c0_130, %c256_131] : memref<16x512xf32, #tpu.memory_space<vmem>>, vector<16x128xf32>
    tpu.vector_store %arg5[%c0_130, %c256_131], %110 {strides = array<i32>} : memref<16x512xf32, #tpu.memory_space<vmem>>, vector<16x128xf32>,
    %c0_132 = arith.constant 0 : index
    %c10 = arith.constant 10 : index
    %c0_133 = arith.constant 0 : index
    %c0_134 = arith.constant 0 : index
    %112 = vector.load %arg4[%c0_132, %c10, %c0_133, %c0_134] : memref<1x12x16x128xf32, #tpu.memory_space<vmem>>, vector<1x1x16x128xf32>
    %113 = vector.shape_cast %112 : vector<1x1x16x128xf32> to vector<16x128xf32>
    %114 = vector.shape_cast %110 : vector<16x128xf32> to vector<1x1x16x128xf32>
    tpu.vector_store %arg4[%c0_132, %c10, %c0_133, %c0_134], %114 {strides = array<i32>} : memref<1x12x16x128xf32, #tpu.memory_space<vmem>>, vector<1x1x16x128xf32>,
    %c0_135 = arith.constant 0 : index
    %c3_136 = arith.constant 3 : index
    %c0_137 = arith.constant 0 : index
    %c0_138 = arith.constant 0 : index
    %115 = vector.load %arg3[%c0_135, %c3_136, %c0_137, %c0_138] : memref<1x4x16x128xf32, #tpu.memory_space<vmem>>, vector<1x1x16x128xf32>
    %116 = vector.shape_cast %115 : vector<1x1x16x128xf32> to vector<16x128xf32>
    %cst_139 = arith.constant 5.000000e-02 : f32
    %117 = vector.broadcast %cst_139 : f32 to vector<16x128xf32>
    %118 = arith.mulf %117, %116 : vector<16x128xf32>
    %c0_140 = arith.constant 0 : index
    %c384_141 = arith.constant 384 : index
    %119 = vector.load %arg6[%c0_140, %c384_141] : memref<16x512xf32, #tpu.memory_space<vmem>>, vector<16x128xf32>
    %cst_142 = arith.constant 0.949999988 : f32
    %120 = vector.broadcast %cst_142 : f32 to vector<16x128xf32>
    %121 = arith.mulf %120, %119 : vector<16x128xf32>
    %122 = arith.addf %118, %121 : vector<16x128xf32>
    %c0_143 = arith.constant 0 : index
    %c384_144 = arith.constant 384 : index
    %123 = vector.load %arg5[%c0_143, %c384_144] : memref<16x512xf32, #tpu.memory_space<vmem>>, vector<16x128xf32>
    tpu.vector_store %arg5[%c0_143, %c384_144], %122 {strides = array<i32>} : memref<16x512xf32, #tpu.memory_space<vmem>>, vector<16x128xf32>,
    %c0_145 = arith.constant 0 : index
    %c11 = arith.constant 11 : index
    %c0_146 = arith.constant 0 : index
    %c0_147 = arith.constant 0 : index
    %124 = vector.load %arg4[%c0_145, %c11, %c0_146, %c0_147] : memref<1x12x16x128xf32, #tpu.memory_space<vmem>>, vector<1x1x16x128xf32>
    %125 = vector.shape_cast %124 : vector<1x1x16x128xf32> to vector<16x128xf32>
    %126 = vector.shape_cast %122 : vector<16x128xf32> to vector<1x1x16x128xf32>
    tpu.vector_store %arg4[%c0_145, %c11, %c0_146, %c0_147], %126 {strides = array<i32>} : memref<1x12x16x128xf32, #tpu.memory_space<vmem>>, vector<1x1x16x128xf32>,
    return
  }
  func.func @transform_0(%arg0: i32, %arg1: i32) -> (i32, i32) {
    %c0_i32 = arith.constant 0 : i32
    %c0_i32_0 = arith.constant 0 : i32
    %c0_i32_1 = arith.constant 0 : i32
    return %c0_i32, %c0_i32_0 : i32, i32
  }
  func.func @transform_1(%arg0: i32, %arg1: i32) -> (i32, i32, i32, i32) {
    %c0_i32 = arith.constant 0 : i32
    %c0_i32_0 = arith.constant 0 : i32
    %c0_i32_1 = arith.constant 0 : i32
    return %arg0, %c0_i32, %c0_i32_0, %arg1 : i32, i32, i32, i32
  }
  func.func @transform_2(%arg0: i32, %arg1: i32) -> (i32, i32, i32, i32) {
    %c0_i32 = arith.constant 0 : i32
    %c0_i32_0 = arith.constant 0 : i32
    %c0_i32_1 = arith.constant 0 : i32
    return %arg0, %c0_i32, %c0_i32_0, %arg1 : i32, i32, i32, i32
  }
}

</mosaic_0001>

<bundles_post_ra>
// kernel: tpu_custom_call.1
= control target key start
LH: loop header
LB: loop body
LE: loop exit
PB: predicated region body
PF: predicated region fallthrough
CT: control target
= control target key end

     0   :  { %s1494_s0 = inlined_call_operand.hbm [shape: f32[16,16], index: 0, kind: input, shape index: {}]   ;;  %s1495_s1 = inlined_call_operand.hbm [shape: f32[2,4,16,256], index: 1, kind: input, shape index: {}]   ;;  %s1496_s2 = inlined_call_operand.hbm [shape: f32[2,12,16,256], index: 2, kind: output, shape index: {}]  }
   0x1   :  { %1505 = sst [smem:[#allocation13_spill]] %s1494_s0 }
   0x2   :  { %7 = vsyncpa [#allocation5], 0 }
   0x3   :  { %8 = vsyncpa [#allocation8], 0 }
   0x4   :  { %10 = vsyncpa [#allocation8 + $0x1], 0 }
   0x5   :  { %11 = vsyncpa [#allocation6], 0 }
   0x6   :  { %13 = vsyncpa [#allocation6 + $0x1], 0  ;;  %s1171_s9 = smov 0   ;;  %s1173_s10 = smov 0  }
   0x7   :  { %s1175_s11 = smov 0   ;;  %s1177_s12 = smov 0  }
   0x8   :  { %s1179_s13 = smov 0   ;;  %s1181_s14 = smov 0  }
   0x9   :  { %s1183_s15 = smov 0   ;;  %s1185_s16 = smov 0  }
   0xa LB: > { %s808_s17 = sadd.s32 4294967295, %s1144_s16   ;;  %s809_s18 = sadd.s32 4294967294, %s1144_s16   ;;  %s1144_s16 = sphi %s1185_s16, %s19_s16   ;;  %s1140_s15 = sphi %s1183_s15, %s1530_s15   ;;  %s1136_s14 = sphi %s1181_s14, %s1529_s14   ;;  %s1132_s13 = sphi %s1179_s13, %s1528_s13   ;;  %s1128_s12 = sphi %s1177_s12, %s1527_s12   ;;  %s1124_s11 = sphi %s1175_s11, %s1526_s11   ;;  %s1120_s10 = sphi %s1173_s10, %s1525_s10   ;;  %s1116_s9 = sphi %s1171_s9, %s1524_s9  }
   0xb   : > { %p68_p0 = scmp.ne.s32.totalorder %s1124_s11, %s1120_s10  ;;  %p69_p1 = scmp.eq.s32.totalorder %s1144_s16, 0 }
   0xc   : > { %p74_p2 = scmp.ne.s32.totalorder %s1120_s10, %s1116_s9  ;;  %p1219_p3 = scmp.eq.s32.totalorder %s808_s17, 0 }
   0xd   : > { %p100_p4 = scmp.eq.s32.totalorder %s808_s17, 3  ;;  %p1223_p5 = por %p69_p1, %p68_p0 }
   0xe   : > { %s1506_s20 = scalar_select %p1219_p3, 1, 0 }
   0xf   : > { %p106_p6 = scmp.eq.s32.totalorder %s809_s18, 3  ;;  %p1229_p7 = por %p1219_p3, %p74_p2 }
  0x10   : > { %p1233_p8 = por %p100_p4, %p68_p0  ;;  %p810_p10 = scmp.ge.s32.totalorder %s1144_s16, 1 }
  0x11   : > { %s1508_s22 = scalar_select %p1229_p7, 1, 0 }
  0x12   : > { %s1509_s23 = scalar_select %p1233_p8, 1, 0 }
  0x13   : > { %p1237_p9 = por %p106_p6, %p74_p2  ;;  %p113_p11 = scmp.lt.s32.totalorder %s1144_s16, 5 }
  0x14   : > { %s1146_s26 = smov [#allocation4]   ;;  %p909_p0 = scmp.lt.s32.totalorder %s1144_s16, 4 }
  0x15   : > { %s1510_s24 = scalar_select %p1237_p9, 1, 0 }
  0x16   : > { %p1243_p12 = pnand %p810_p10, %p113_p11  ;;  %s125_s27 = sshll.u32 %s1146_s26, 4  ;;  %s126_s27 = int_to_ptr.vmem [resolvable:$true] %s125_s27 }
  0x17   : > { %p1258_p2 = pnand %p909_p0, %p1223_p5  ;;  %s1514_s0 = sld [smem:[#allocation13_spill]] }
  0x18   : > { %s1511_s25 = scalar_select %p1243_p12, 1, 0 }
  0x19   : > { %p896_p13 = pneg %p1243_p12 }
  0x1a   : > { %s1513_s29 = scalar_select %p1258_p2, 1, 0 }
  0x1b   : > { %p1252_p1 = pnand %p896_p13, %p1219_p3 }
  0x1d   : > { %s984_s4 = scalar_lea.hbm %s1514_s0, 256  ;;  %p986_p6 = pneg %p1252_p1 }
  0x1e   : > { %p985_p4 = scmp.ne.s32.totalorder %s1514_s0, %s984_s4  ;;  %p991_p13 = scmp.lt.u32.totalorder %s984_s4, %s1514_s0 }
  0x20   : > { %p987_p10 = pnand %p986_p6, %p985_p4 }
  0x22   : > { %p988_p11 = pneg %p987_p10 }
  0x24   : > { %p993_p5 = pnand %p991_p13, %p988_p11 }
  0x26   : > { %996 = shalt.err (!%p993_p5)
}
  0x27   : > { %s997_s17 = scalar_lea.vmem %s126_s27, 256  ;;  %p1005_p7 = scmp.lt.s32.totalorder %s126_s27, %s126_s27 }
  0x28   : > { %p998_p0 = scmp.ne.s32.totalorder %s126_s27, %s997_s17  ;;  %p1006_p3 = scmp.lt.s32.totalorder %s997_s17, %s997_s17 }
  0x2a   : > { %p1000_p9 = pnand %p998_p0, %p986_p6  ;;  %p1007_p12 = por %p1006_p3, %p1005_p7 }
  0x2c   : > { %p1001_p8 = pneg %p1000_p9 }
  0x2e   : > { %p1008_p2 = pnand %p1007_p12, %p1001_p8 }
  0x30   : > { %1011 = shalt.err (!%p1008_p2)
}
  0x31   : > { %s1503_s18 = smov 128   ;;  %s1504_s21 = smov 8  }
  0x32   : > { %899 = dma.hbm_to_vmem [thread:$0]  (!%p1252_p1), %s1514_s0, 256, %s126_s27, [#allocation5], %s1503_s18, %s1503_s18, %s1504_s21  }
  0x33   : > { %s28_s3 = sadd.s32 1, %s1136_s14  ;;  %s31_s4 = sadd.s32 1, %s1140_s15 }
  0x34   : > { %p29_p3 = scmp.ge.s32.totalorder %s28_s3, 2  ;;  %s139_s5 = sand.u32 1, %s1124_s11  }
  0x35   : > { %s814_s6 = sshll.u32 %s1140_s15, 4  ;;  %s813_s28 = sshll.u32 %s139_s5, 6 }
  0x36   : > { %s1532_s3 = smov (%p29_p3, %s28_s3), 0  ;;  %s1534_s4 = smov (!%p29_p3, %s31_s4), %s1140_s15 }
  0x37   : > { %s57_s7 = ssub.s32 %s1136_s14, %s1532_s3  ;;  %p33_p7 = scmp.ge.s32.totalorder %s1534_s4, 2 }
  0x38   : > { %s148_s8 = sadd.s32 %s1136_s14, %s814_s6  ;;  %s143_s17 = scalar_lea.vmem [#allocation7], %s813_s28 }
  0x39   : > { %s1536_s4 = smov (%p33_p7, %s1534_s4), 0  ;;  %s815_s27 = sshll.u32 %s148_s8, 7 }
  0x3a   : > { %s151_s26 = sshll.u32 %s143_s17, 4  ;;  %s56_s30 = ssub.s32 %s1140_s15, %s1536_s4  ;;  %s1302_s26 = int_to_ptr.vmem [resolvable:$true] %s151_s26 }
  0x3b   : > { %s1298_s21 = scalar_lea.hbm %s1495_s1, %s815_s27  ;;  %s1300_s0 = sor.u32 %s57_s7, %s56_s30 }
  0x3c   : > { %p59_p8 = scmp.eq.s32.totalorder %s1300_s0, 0  ;;  %s1305_s6 = scalar_lea.sflag [#allocation8], %s139_s5 }
  0x3d   : > { %s1012_s28 = scalar_lea.hbm %s1298_s21, 1024  ;;  %p1515_p12 = scmp.ne.s32.totalorder %s1513_s29, 0 }
  0x3e   : > { %p1013_p9 = scmp.ne.s32.totalorder %s1298_s21, %s1012_s28  ;;  %s1017_s8 = scalar_lea.hbm %s1495_s1, 4096 }
  0x3f   : > { %p1014_p1 = pneg %p1515_p12  ;;  %p1018_p6 = scmp.lt.u32.totalorder %s1298_s21, %s1495_s1 }
  0x40   : > { %p1019_p10 = scmp.lt.u32.totalorder %s1017_s8, %s1012_s28  ;;  %p1021_p13 = scmp.lt.u32.totalorder %s1012_s28, %s1298_s21 }
  0x41   : > { %p1015_p2 = pnand %p1014_p1, %p1013_p9 }
  0x42   : > { %p1020_p11 = por %p1019_p10, %p1018_p6 }
  0x43   : > { %p1016_p4 = pneg %p1015_p2 }
  0x44   : > { %p1022_p5 = por %p1021_p13, %p1020_p11 }
  0x46   : > { %p1023_p0 = pnand %p1022_p5, %p1016_p4 }
  0x48   : > { %1026 = shalt.err (!%p1023_p0)
}
  0x49   : > { %s1027_s5 = scalar_lea.vmem %s1302_s26, 1024  ;;  %s1149_s17 = smov [#allocation7]  }
  0x4a   : > { %p1028_p3 = scmp.ne.s32.totalorder %s1302_s26, %s1027_s5  ;;  %s1032_s30 = sshll.u32 %s1149_s17, 4  ;;  %s1033_s30 = int_to_ptr.vmem [resolvable:$false] %s1032_s30 }
  0x4b   : > { %s1034_s19 = scalar_lea.vmem %s1033_s30, 2048  ;;  %p1035_p2 = scmp.lt.s32.totalorder %s1302_s26, %s1033_s30 }
  0x4c   : > { %p1030_p7 = pnand %p1028_p3, %p1014_p1  ;;  %p1036_p6 = scmp.lt.s32.totalorder %s1034_s19, %s1027_s5 }
  0x4e   : > { %p1031_p9 = pneg %p1030_p7  ;;  %p1037_p10 = por %p1036_p6, %p1035_p2 }
  0x50   : > { %p1038_p11 = pnand %p1037_p10, %p1031_p9 }
  0x52   : > { %1041 = shalt.err (!%p1038_p11)
}
  0x53   : > { %s1150_s28 = smov 256   ;;  %s1516_s18 = smov 8  }
  0x54   : > { %s1517_s8 = smov 128   ;;  %s1518_s7 = sadd.s32 1, %s1124_s11 }
  0x55   : > { %903 = dma.hbm_to_vmem [thread:$0]  (!%p1515_p12), %s1298_s21, 1024, %s1302_s26, %s1305_s6, %s1150_s28, %s1517_s8, %s1516_s18  }
  0x56   : > { %s1340_s27 = scalar_select %p59_p8, %s1124_s11, %s1518_s7  }
  0x57   : > { %p1519_p1 = scmp.ne.s32.totalorder %s1511_s25, 0 }
  0x58   : > { %p1520_p4 = scmp.ne.s32.totalorder (!%p1519_p1), %s1506_s20, 0 }
  0x59   : > { %163 = sbr.rel (%p1519_p1) target bundleno = 575 (0x23f), region = 28 }
  0x60   : > { %1103 = dma.done.wait (%p1520_p4), [#allocation5], 256  }
  0x61   : > { %1105 = vsyncadd (%p1520_p4), [#allocation5], 4294967040  ;;  %s1349_s29 = sand.u32 1, %s1120_s10   ;;  %p1521_p8 = scmp.ne.s32.totalorder %s1508_s22, 0 }
  0x62   : > { %s818_s21 = sshll.u32 %s1349_s29, 6  ;;  %s170_s26 = scalar_lea.sflag [#allocation8], %s1349_s29 }
  0x63   : > { %s173_s0 = scalar_lea.vmem [#allocation7], %s818_s21 }
  0x64   : > { %1107 = dma.done.wait (%p1521_p8), %s170_s26, 1024  }
  0x65   : > { %1109 = vsyncadd (%p1521_p8), %s170_s26, 4294966272  ;;  %v1151_v0 = vmov 0.0   ;;  %s886_s20 = smul.u32 192, %s1349_s29  ;;  %v819_v1 = vld [vmem:[%s173_s0 + $0x10] sm:$0xff]  ;;  %v820_v2 = vld [vmem:[%s173_s0 + $0x18] sm:$0xff]  ;;  %vm234_vm0 = vcmask 130048  }
  0x66   : > { %305 = vmatprep.mubr.f32.mxu0 %v1151_v0  ;;  %382 = vmatprep.mubr.f32.mxu1 %v1151_v0  ;;  %v827_v3 = vld [vmem:[%s173_s0 + $0x30] sm:$0xff]  ;;  %v870_v4 = vpack.c.bf16 %v820_v2, %v819_v1  ;;  %v828_v5 = vld [vmem:[%s173_s0 + $0x38] sm:$0xff]  ;;  %v196_v6 = vld [vmem:[%s173_s0] sm:$0xff]  ;;  %v1382_v18 = vmul.f32 0.05, %v819_v1  ;;  %s887_s22 = smul.u32 48, %s1132_s13 }
  0x67   : > { %s1360_s25 = scalar_lea.vmem [#allocation9], %s886_s20  ;;  %v197_v7 = vld [vmem:[%s173_s0 + $0x8] sm:$0xff]  ;;  %v874_v8 = vpack.c.bf16 %v828_v5, %v827_v3  ;;  %v823_v10 = vld [vmem:[%s173_s0 + $0x20] sm:$0xff]  ;;  %v194_v13 = vld [vmem:[#allocation4] sm:$0xff]  ;;  %v1378_v15 = vmul.f32 0.05, %v196_v6 }
  0x68   : > { %821 = vst [vmem:[%s1360_s25 + $0x10] sm:$0xff] %v819_v1  ;;  %822 = vst [vmem:[%s1360_s25 + $0x18] sm:$0xff] %v820_v2  ;;  %v872_v9 = vpack.c.bf16 %v197_v7, %v196_v6  ;;  %v824_v11 = vld [vmem:[%s173_s0 + $0x28] sm:$0xff]  ;;  %871 = vmatprep.subr.bf16.mxu0 %v870_v4  ;;  %v195_v14 = vld [vmem:[#allocation4 + $0x8] sm:$0xff]  ;;  %v1380_v17 = vmul.f32 0.05, %v823_v10  ;;  %s705_s6 = sadd.s32 %s1128_s12, %s887_s22 }
  0x69   : > { %829 = vst [vmem:[%s1360_s25 + $0x30] sm:$0xff] %v827_v3  ;;  %830 = vst [vmem:[%s1360_s25 + $0x38] sm:$0xff] %v828_v5  ;;  %v876_v12 = vpack.c.bf16 %v824_v11, %v823_v10  ;;  %875 = vmatprep.subr.bf16.mxu1 %v874_v8  ;;  %v1384_v22 = vmul.f32 0.05, %v827_v3  ;;  %v1387_v28 = vmul.f32 0.05, %v197_v7 }
  0x6a   : > { %200 = vst [vmem:[%s1360_s25] sm:$0xff] %v196_v6  ;;  %201 = vst [vmem:[%s1360_s25 + $0x8] sm:$0xff] %v197_v7  ;;  %873 = vmatpush1.bf16.msra.mxu0 %v872_v9  ;;  %v1391_v32 = vmul.f32 0.05, %v824_v11  ;;  %v1393_v33 = vmul.f32 0.05, %v820_v2  ;;  %s867_s13 = sshll.u32 %s705_s6, 7 }
  0x6b   : > { %825 = vst [vmem:[%s1360_s25 + $0x20] sm:$0xff] %v823_v10  ;;  %826 = vst [vmem:[%s1360_s25 + $0x28] sm:$0xff] %v824_v11  ;;  %877 = vmatpush1.bf16.msra.mxu1 %v876_v12  ;;  %v1397_v38 = vmul.f32 0.05, %v828_v5  ;;  %s708_s12 = sshll.u32 %s1360_s25, 4  ;;  %s1431_s30 = scalar_lea.hbm %s1496_s2, %s867_s13  ;;  %s1435_s12 = int_to_ptr.vmem [resolvable:$true] %s708_s12 }
  0x6c   : > { %s694_s19 = scalar_lea.sflag [#allocation6], %s1349_s29  ;;  %s1042_s28 = scalar_lea.vmem %s1435_s12, 3072 }
  0x6d   : > { %831 = vmatmul.mubr.msk.f32.vlgmr.msra.gmra.mrb[0].mxu0 %vm234_vm0, %v194_v13  ;;  %p1043_p12 = scmp.ne.s32.totalorder %s1435_s12, %s1042_s28  ;;  %p1522_p13 = scmp.ne.s32.totalorder %s1509_s23, 0 }
  0x6e   : > { %833 = vmatmul.mubr.msk.f32.vlgmr.msra.gmra.mrb[0].mxu1 %vm234_vm0, %v194_v13  ;;  %311 = vmatprep.mubr.f32.mxu0 %v1151_v0  ;;  %s1152_s18 = smov [#allocation9]  }
  0x6f   : > { %388 = vmatprep.mubr.f32.mxu1 %v1151_v0  ;;  %p1044_p5 = pnand %p1043_p12, %p1522_p13  ;;  %s1046_s8 = sshll.u32 %s1152_s18, 4  ;;  %s1047_s8 = int_to_ptr.vmem [resolvable:$false] %s1046_s8 }
  0x70   : > { %s1048_s7 = scalar_lea.vmem %s1047_s8, 6144  ;;  %p1049_p3 = scmp.lt.s32.totalorder %s1435_s12, %s1047_s8 }
  0x71   : > { %832 = vmatmul.mubr.msk.f32.gmra.mrb[2].mxu0 %vm234_vm0, %v195_v14  ;;  %p1045_p0 = pneg %p1044_p5  ;;  %p1050_p7 = scmp.lt.s32.totalorder %s1048_s7, %s1042_s28 }
  0x72   : > { %834 = vmatmul.mubr.msk.f32.gmra.mrb[2].mxu1 %vm234_vm0, %v195_v14  ;;  %535 = vmatprep.mubr.f32.mxu0 %v1151_v0 }
  0x73   : > { %612 = vmatprep.mubr.f32.mxu1 %v1151_v0  ;;  %p1051_p9 = por %p1050_p7, %p1049_p3 }
  0x75   : > { %p1052_p2 = pnand %p1051_p9, %p1045_p0 }
 0x140   : > { %v307_v16 = vpop.f32.mrb[0].mxu0 }
 0x141   : > { %v409_v19 = vmul.f32 0.95, %v307_v16  ;;  %v384_v20 = vpop.f32.mrb[0].mxu1  ;;  %v309_v21 = vpop.f32.mrb[1].mxu0 }
 0x142   : > { %v439_v23 = vmul.f32 0.95, %v384_v20  ;;  %v424_v24 = vmul.f32 0.95, %v309_v21  ;;  %v386_v25 = vpop.f32.mrb[1].mxu1 }
 0x143   : > { %v411_v26 = vadd.f32 %v409_v19, %v1378_v15  ;;  %v454_v27 = vmul.f32 0.95, %v386_v25 }
 0x144   : > { %v441_v29 = vadd.f32 %v439_v23, %v1380_v17  ;;  %v426_v30 = vadd.f32 %v424_v24, %v1382_v18  ;;  %v313_v31 = vpop.f32.mrb[2].mxu0 }
 0x145   : > { %835 = vst [vmem:[%s1360_s25 + $0x40] sm:$0xff] %v411_v26  ;;  %v456_v34 = vadd.f32 %v454_v27, %v1384_v22  ;;  %v410_v35 = vmul.f32 0.95, %v313_v31  ;;  %v390_v36 = vpop.f32.mrb[2].mxu1  ;;  %v315_v37 = vpop.f32.mrb[3].mxu0 }
 0x146   : > { %843 = vst [vmem:[%s1360_s25 + $0x60] sm:$0xff] %v441_v29  ;;  %839 = vst [vmem:[%s1360_s25 + $0x50] sm:$0xff] %v426_v30  ;;  %v440_v39 = vmul.f32 0.95, %v390_v36  ;;  %v425_v40 = vmul.f32 0.95, %v315_v37 }
 0x147   : > { %v392_v41 = vpop.f32.mrb[3].mxu1  ;;  %847 = vst [vmem:[%s1360_s25 + $0x70] sm:$0xff] %v456_v34  ;;  %v412_v42 = vadd.f32 %v410_v35, %v1387_v28 }
 0x148   : > { %v455_v43 = vmul.f32 0.95, %v392_v41  ;;  %v442_v44 = vadd.f32 %v440_v39, %v1391_v32  ;;  %v427_v45 = vadd.f32 %v425_v40, %v1393_v33 }
 0x149   : > { %836 = vst [vmem:[%s1360_s25 + $0x48] sm:$0xff] %v412_v42  ;;  %v880_v46 = vpack.c.bf16 %v412_v42, %v411_v26 }
 0x14a   : > { %v457_v47 = vadd.f32 %v455_v43, %v1397_v38  ;;  %844 = vst [vmem:[%s1360_s25 + $0x68] sm:$0xff] %v442_v44  ;;  %v884_v48 = vpack.c.bf16 %v442_v44, %v441_v29  ;;  %840 = vst [vmem:[%s1360_s25 + $0x58] sm:$0xff] %v427_v45  ;;  %v878_v49 = vpack.c.bf16 %v427_v45, %v426_v30 }
 0x14c   : > { %848 = vst [vmem:[%s1360_s25 + $0x78] sm:$0xff] %v457_v47  ;;  %v882_v50 = vpack.c.bf16 %v457_v47, %v456_v34  ;;  %879 = vmatprep.subr.bf16.mxu0 %v878_v49 }
 0x14d   : > { %881 = vmatpush1.bf16.msra.mxu0 %v880_v46 }
 0x14e   : > { %883 = vmatprep.subr.bf16.mxu1 %v882_v50 }
 0x14f   : > { %885 = vmatpush1.bf16.msra.mxu1 %v884_v48 }
 0x150   : > { %849 = vmatmul.mubr.msk.f32.vlgmr.msra.gmra.mrb[4].mxu0 %vm234_vm0, %v194_v13 }
 0x151   : > { %541 = vmatprep.mubr.f32.mxu0 %v1151_v0 }
 0x152   : > { %851 = vmatmul.mubr.msk.f32.vlgmr.msra.gmra.mrb[4].mxu1 %vm234_vm0, %v194_v13 }
 0x153   : > { %618 = vmatprep.mubr.f32.mxu1 %v1151_v0 }
 0x154   : > { %850 = vmatmul.mubr.msk.f32.gmra.mrb[6].mxu0 %vm234_vm0, %v195_v14 }
 0x156   : > { %852 = vmatmul.mubr.msk.f32.gmra.mrb[6].mxu1 %vm234_vm0, %v195_v14 }
 0x223   : > { %v537_v51 = vpop.f32.mrb[4].mxu0 }
 0x224   : > { %v639_v52 = vmul.f32 0.95, %v537_v51  ;;  %v539_v54 = vpop.f32.mrb[5].mxu0 }
 0x225   : > { %v614_v53 = vpop.f32.mrb[4].mxu1  ;;  %v654_v56 = vmul.f32 0.95, %v539_v54 }
 0x226   : > { %v669_v55 = vmul.f32 0.95, %v614_v53  ;;  %v616_v57 = vpop.f32.mrb[5].mxu1  ;;  %v641_v58 = vadd.f32 %v639_v52, %v1378_v15 }
 0x227   : > { %v684_v59 = vmul.f32 0.95, %v616_v57  ;;  %v656_v61 = vadd.f32 %v654_v56, %v1382_v18  ;;  %v543_v62 = vpop.f32.mrb[6].mxu0 }
 0x228   : > { %v671_v60 = vadd.f32 %v669_v55, %v1380_v17  ;;  %853 = vst [vmem:[%s1360_s25 + $0x80] sm:$0xff] %v641_v58  ;;  %v640_v0 = vmul.f32 0.95, %v543_v62  ;;  %v545_v2 = vpop.f32.mrb[7].mxu0 }
 0x229   : > { %v686_v63 = vadd.f32 %v684_v59, %v1384_v22  ;;  %v620_v1 = vpop.f32.mrb[6].mxu1  ;;  %857 = vst [vmem:[%s1360_s25 + $0x90] sm:$0xff] %v656_v61  ;;  %v655_v4 = vmul.f32 0.95, %v545_v2 }
 0x22a   : > { %861 = vst [vmem:[%s1360_s25 + $0xa0] sm:$0xff] %v671_v60  ;;  %v670_v3 = vmul.f32 0.95, %v620_v1  ;;  %v622_v5 = vpop.f32.mrb[7].mxu1  ;;  %v642_v6 = vadd.f32 %v640_v0, %v1387_v28 }
 0x22b   : > { %865 = vst [vmem:[%s1360_s25 + $0xb0] sm:$0xff] %v686_v63  ;;  %v685_v7 = vmul.f32 0.95, %v622_v5  ;;  %v657_v9 = vadd.f32 %v655_v4, %v1393_v33 }
 0x22c   : > { %v672_v8 = vadd.f32 %v670_v3, %v1391_v32  ;;  %854 = vst [vmem:[%s1360_s25 + $0x88] sm:$0xff] %v642_v6 }
 0x22d   : > { %v687_v10 = vadd.f32 %v685_v7, %v1397_v38  ;;  %858 = vst [vmem:[%s1360_s25 + $0x98] sm:$0xff] %v657_v9 }
 0x22e   : > { %862 = vst [vmem:[%s1360_s25 + $0xa8] sm:$0xff] %v672_v8 }
 0x22f   : > { %866 = vst [vmem:[%s1360_s25 + $0xb8] sm:$0xff] %v687_v10 }
 0x230   : > { %1055 = shalt.err (!%p1052_p2)
}
 0x231   : > { %s1056_s21 = scalar_lea.hbm %s1431_s30, 3072  ;;  %s1060_s20 = scalar_lea.hbm %s1496_s2, 12288 }
 0x232   : > { %p1057_p6 = scmp.ne.s32.totalorder %s1431_s30, %s1056_s21  ;;  %p1061_p1 = scmp.lt.u32.totalorder %s1431_s30, %s1496_s2 }
 0x233   : > { %p1062_p4 = scmp.lt.u32.totalorder %s1060_s20, %s1056_s21  ;;  %p1064_p12 = scmp.lt.u32.totalorder %s1056_s21, %s1431_s30 }
 0x234   : > { %p1058_p10 = pnand %p1057_p6, %p1522_p13 }
 0x235   : > { %p1063_p8 = por %p1062_p4, %p1061_p1 }
 0x236   : > { %p1059_p11 = pneg %p1058_p10 }
 0x237   : > { %p1065_p5 = por %p1064_p12, %p1063_p8 }
 0x239   : > { %p1066_p0 = pnand %p1065_p5, %p1059_p11 }
 0x23b   : > { %1069 = shalt.err (!%p1066_p0)
}
 0x23c   : > { %s1153_s6 = smov 128   ;;  %s1154_s13 = smov 256  }
 0x23d   : > { %s1155_s5 = smov 8  }
 0x23e   : > { %894 = dma.vmem_to_hbm [thread:$0]  (%p1522_p13), %s1435_s12, 3072, %s1431_s30, %s694_s19, %s1153_s6, %s1154_s13, %s1155_s5  }
 0x23f PF: > { %p911_p3 = scmp.ge.s32.totalorder %s1144_s16, 2  ;;  %s723_s17 = sand.u32 1, %s1116_s9  }
 0x240   : > { %p1523_p7 = scmp.ne.s32.totalorder %s1510_s24, 0  ;;  %s724_s28 = scalar_lea.sflag [#allocation6], %s723_s17 }
 0x242   : > { %p905_p9 = pnand %p911_p3, %p1523_p7 }
 0x244   : > { %1111 = dma.done.wait (!%p905_p9), %s724_s28, 3072  }
 0x245   : > { %1113 = vsyncadd (!%p905_p9), %s724_s28, 4294964224  ;;  %s19_s16 = sadd.s32 1, %s1144_s16   ;;  %s1524_s9 = smov %s1120_s10 }
 0x246   : > { %p16_p2 = scmp.ge.s32.totalorder %s19_s16, 6   ;;  %s1525_s10 = smov %s1124_s11 }
 0x247   : > { %s1526_s11 = smov %s1340_s27  ;;  %s1527_s12 = smov %s1136_s14 }
 0x248   : > { %s1528_s13 = smov %s1140_s15  ;;  %s1529_s14 = smov %s1532_s3 }
 0x249   : > { %s1530_s15 = smov %s1536_s4  ;;  %18 = sbr.rel (!%p16_p2) target bundleno = 10 (0xa), region = 92 }
 0x250   :  { %729 = vsyncpa [#allocation5], 1 }
 0x251   :  { %731 = vsyncpa [#allocation5 + $0x1], 1 }
 0x252   :  { %732 = vsyncpa [#allocation8], 1 }
 0x253   :  { %734 = vsyncpa [#allocation8 + $0x1], 1 }
 0x254   :  { %735 = vsyncpa [#allocation6], 1 }
 0x255   :  { %737 = vsyncpa [#allocation6 + $0x1], 1 }

</bundles_post_ra>
